<compile_context>
chip_gen: v6e
topology: v6e:2x2x1
jax: 0.10.0
libtpu: 0.0.40
codegen_flags: <defaults>
</compile_context>

<pallas_src>
import math
import functools

import jax
import jax.numpy as jnp
from jax.experimental import pallas as pl
from jax.experimental.pallas import tpu as pltpu


def _vmem_limit_bytes():
    # ~3/4 of physical VMEM: v5e/v6e ~96-100 MiB of 128, v7x ~48 MiB of 64.
    try:
        cap = getattr(pltpu.get_tpu_info(), "vmem_capacity_bytes", None)
        if cap:
            return int(min(cap - cap // 4, 112 * 1024 * 1024))
    except Exception:
        pass
    return 48 * 1024 * 1024


_VMEM_LIMIT = _vmem_limit_bytes()


# ----------------------------------------------------------------------------
# elementwise helpers (f32)
# ----------------------------------------------------------------------------
def _layernorm(x, gamma, beta, eps):
    # Single-pass stats (sum + sum-of-squares), biased variance like nn.LayerNorm.
    n = x.shape[-1]
    s = jnp.sum(x, axis=-1, keepdims=True)
    ss = jnp.sum(x * x, axis=-1, keepdims=True)
    mu = s * (1.0 / n)
    var = jnp.maximum(ss * (1.0 / n) - mu * mu, 0.0)
    return (x - mu) * jax.lax.rsqrt(var + eps) * gamma + beta


def _gelu_exact(x):
    # F.gelu default = exact (erf-based) gelu.
    return 0.5 * x * (1.0 + jax.lax.erf(x * (1.0 / math.sqrt(2.0))))


# ----------------------------------------------------------------------------
# Kernel 1: LN1 + QKV projection   (grid: M-row tiles x 3H-column tiles)
#           LN1 is computed once per row tile (column axis innermost/arbitrary).
# ----------------------------------------------------------------------------
def _ln_qkv_kernel(x_ref, g_ref, b_ref, w_ref, bias_ref, o_ref, h_sc, *, eps):
    @pl.when(pl.program_id(1) == 0)
    def _():
        h_sc[...] = _layernorm(x_ref[...], g_ref[...], b_ref[...], eps
                               ).astype(h_sc.dtype)

    acc = jnp.dot(h_sc[...], w_ref[...], preferred_element_type=jnp.float32)
    o_ref[...] = (acc + bias_ref[...]).astype(o_ref.dtype)


def _ln_qkv(x2d, gamma, beta, w_bf16, bias, *, eps, tm, tc):
    M, H = x2d.shape
    C = w_bf16.shape[1]
    cost = pl.CostEstimate(
        flops=int(2 * M * H * C),
        transcendentals=int(M),
        bytes_accessed=int(M * H * 4 + (M // tm) * H * C * 2 + M * C * 2))
    return pl.pallas_call(
        functools.partial(_ln_qkv_kernel, eps=eps),
        out_shape=jax.ShapeDtypeStruct((M, C), jnp.bfloat16),
        grid_spec=pltpu.PrefetchScalarGridSpec(
            num_scalar_prefetch=0,
            grid=(M // tm, C // tc),
            in_specs=[
                pl.BlockSpec((tm, H), lambda mi, ci: (mi, 0)),
                pl.BlockSpec((1, H), lambda mi, ci: (0, 0)),
                pl.BlockSpec((1, H), lambda mi, ci: (0, 0)),
                pl.BlockSpec((H, tc), lambda mi, ci: (0, ci)),   # stream Wqkv cols
                pl.BlockSpec((1, tc), lambda mi, ci: (0, ci)),
            ],
            out_specs=pl.BlockSpec((tm, tc), lambda mi, ci: (mi, ci)),
            scratch_shapes=[pltpu.VMEM((tm, H), jnp.bfloat16)],   # LN1(x) bf16
        ),
        compiler_params=pltpu.CompilerParams(
            dimension_semantics=("parallel", "arbitrary"),
            vmem_limit_bytes=_VMEM_LIMIT),
        cost_estimate=cost,
    )(x2d, gamma, beta, w_bf16, bias)


# ----------------------------------------------------------------------------
# Kernel 2: flash attention, online softmax.
#   grid: B x NH x Q-tiles x KV-tiles (KV innermost, "arbitrary").
#   1/sqrt(D) is folded into Wqkv's q columns by the wrapper.
# ----------------------------------------------------------------------------
def _flash_attn_kernel(q_ref, k_ref, v_ref, o_ref, m_sc, l_sc, acc_sc):
    ki = pl.program_id(3)

    @pl.when(ki == 0)
    def _():
        m_sc[...] = jnp.full(m_sc.shape, -jnp.inf, m_sc.dtype)
        l_sc[...] = jnp.zeros(l_sc.shape, l_sc.dtype)
        acc_sc[...] = jnp.zeros(acc_sc.shape, acc_sc.dtype)

    # scores = q @ k^T (contract last dims; no transpose materialized), f32 acc.
    s = jax.lax.dot_general(q_ref[...], k_ref[...], (((1,), (1,)), ((), ())),
                            preferred_element_type=jnp.float32)        # (tq, tk)

    m_prev = m_sc[...]
    m_new = jnp.maximum(m_prev, jnp.max(s, axis=-1, keepdims=True))
    alpha = jnp.exp(m_prev - m_new)
    p = jnp.exp(s - m_new)
    l_sc[...] = alpha * l_sc[...] + jnp.sum(p, axis=-1, keepdims=True)
    acc_sc[...] = alpha * acc_sc[...] + jnp.dot(
        p.astype(jnp.bfloat16), v_ref[...], preferred_element_type=jnp.float32)
    m_sc[...] = m_new

    @pl.when(ki == pl.num_programs(3) - 1)
    def _():
        # 1/sum applied once to the (tq, D) accumulator, on the EUP (approx).
        inv_l = pl.reciprocal(l_sc[...], approx=True)
        o_ref[...] = (acc_sc[...] * inv_l).astype(o_ref.dtype)


def _attn_cost(B, NH, S, D, tq):
    return pl.CostEstimate(
        flops=int(4 * B * NH * S * S * D),
        transcendentals=int(B * NH * S * S),
        bytes_accessed=int(B * S * NH * D * 2 * (2 + 2 * (S // tq))))


def _flash_attention_fused(qkv, *, n_head, head_dim, tq, tk):
    """Heads indexed directly out of (B,S,3H); output written as (B,S,H).

    Requires head_dim % 128 == 0 (lane-dense head blocks); no wrapper transposes.
    """
    B, S, C = qkv.shape
    H = C // 3
    NH, D = n_head, head_dim
    return pl.pallas_call(
        _flash_attn_kernel,
        out_shape=jax.ShapeDtypeStruct((B, S, H), jnp.bfloat16),
        grid_spec=pltpu.PrefetchScalarGridSpec(
            num_scalar_prefetch=0,
            grid=(B, NH, S // tq, S // tk),
            in_specs=[
                # q head h lives in qkv columns [h*D:(h+1)*D] -> column block h
                pl.BlockSpec((None, tq, D), lambda b, h, qi, ki: (b, qi, h)),
                # k head h -> column block NH + h
                pl.BlockSpec((None, tk, D), lambda b, h, qi, ki: (b, ki, NH + h)),
                # v head h -> column block 2*NH + h
                pl.BlockSpec((None, tk, D),
                             lambda b, h, qi, ki: (b, ki, 2 * NH + h)),
            ],
            out_specs=pl.BlockSpec((None, tq, D), lambda b, h, qi, ki: (b, qi, h)),
            scratch_shapes=[
                pltpu.VMEM((tq, 1), jnp.float32),   # running max
                pltpu.VMEM((tq, 1), jnp.float32),   # running sum
                pltpu.VMEM((tq, D), jnp.float32),   # output accumulator
            ]),
        compiler_params=pltpu.CompilerParams(
            dimension_semantics=("parallel", "parallel", "parallel", "arbitrary"),
            vmem_limit_bytes=_VMEM_LIMIT),
        cost_estimate=_attn_cost(B, NH, S, D, tq),
    )(qkv, qkv, qkv)


def _flash_attention_split(q, k, v, *, tq, tk):
    """Fallback for lane-misaligned head_dim: q/k/v pre-split to (B,NH,S,D)."""
    B, NH, S, D = q.shape
    return pl.pallas_call(
        _flash_attn_kernel,
        out_shape=jax.ShapeDtypeStruct((B, NH, S, D), jnp.bfloat16),
        grid_spec=pltpu.PrefetchScalarGridSpec(
            num_scalar_prefetch=0,
            grid=(B, NH, S // tq, S // tk),
            in_specs=[
                pl.BlockSpec((None, None, tq, D),
                             lambda b, h, qi, ki: (b, h, qi, 0)),
                pl.BlockSpec((None, None, tk, D),
                             lambda b, h, qi, ki: (b, h, ki, 0)),
                pl.BlockSpec((None, None, tk, D),
                             lambda b, h, qi, ki: (b, h, ki, 0)),
            ],
            out_specs=pl.BlockSpec((None, None, tq, D),
                                   lambda b, h, qi, ki: (b, h, qi, 0)),
            scratch_shapes=[
                pltpu.VMEM((tq, 1), jnp.float32),
                pltpu.VMEM((tq, 1), jnp.float32),
                pltpu.VMEM((tq, D), jnp.float32),
            ]),
        compiler_params=pltpu.CompilerParams(
            dimension_semantics=("parallel", "parallel", "parallel", "arbitrary"),
            vmem_limit_bytes=_VMEM_LIMIT),
        cost_estimate=_attn_cost(B, NH, S, D, tq),
    )(q, k, v)


# ----------------------------------------------------------------------------
# Kernel 3a: attention output projection + residual.
#            Wproj columns are streamed (never resident) -> fits v7x VMEM at
#            production H.  grid: M-row tiles x H-column tiles (both parallel).
# ----------------------------------------------------------------------------
def _proj_residual_kernel(x_ref, a_ref, wp_ref, bp_ref, o_ref):
    proj = jnp.dot(a_ref[...], wp_ref[...], preferred_element_type=jnp.float32)
    o_ref[...] = x_ref[...] + proj + bp_ref[...]


def _proj_residual(x2d, attn2d, wproj_bf16, bproj, *, tm, tc):
    M, H = x2d.shape
    cost = pl.CostEstimate(
        flops=int(2 * M * H * H),
        transcendentals=0,
        bytes_accessed=int(M * H * 4 + M * H * 2 + (M // tm) * H * H * 2
                           + M * H * 4))
    return pl.pallas_call(
        _proj_residual_kernel,
        out_shape=jax.ShapeDtypeStruct((M, H), jnp.float32),
        grid_spec=pltpu.PrefetchScalarGridSpec(
            num_scalar_prefetch=0,
            grid=(M // tm, H // tc),
            in_specs=[
                pl.BlockSpec((tm, tc), lambda mi, ci: (mi, ci)),   # x (residual)
                pl.BlockSpec((tm, H), lambda mi, ci: (mi, 0)),     # attn (bf16)
                pl.BlockSpec((H, tc), lambda mi, ci: (0, ci)),     # Wproj cols
                pl.BlockSpec((1, tc), lambda mi, ci: (0, ci)),     # bproj
            ],
            out_specs=pl.BlockSpec((tm, tc), lambda mi, ci: (mi, ci)),
        ),
        compiler_params=pltpu.CompilerParams(
            dimension_semantics=("parallel", "parallel"),
            vmem_limit_bytes=_VMEM_LIMIT),
        cost_estimate=cost,
    )(x2d, attn2d, wproj_bf16, bproj)


# ----------------------------------------------------------------------------
# Kernel 3b: LN2 + MLP (fc1 + exact gelu + fc2) with 4H-chunked reduction.
#            The (M,4H) intermediate never exists; W1/W2 chunks are streamed.
#            grid: M-row tiles x 4H-chunks (chunk axis is a reduction).
# ----------------------------------------------------------------------------
def _ln_mlp_kernel(x1_ref, g_ref, b_ref, w1_ref, b1_ref, w2_ref, b2_ref, o_ref,
                   h2_sc, acc_sc, *, eps):
    fi = pl.program_id(1)

    @pl.when(fi == 0)
    def _():
        h2_sc[...] = _layernorm(x1_ref[...], g_ref[...], b_ref[...], eps
                                ).astype(h2_sc.dtype)
        acc_sc[...] = jnp.zeros(acc_sc.shape, acc_sc.dtype)

    ff = jnp.dot(h2_sc[...], w1_ref[...],
                 preferred_element_type=jnp.float32) + b1_ref[...]   # (tm, tf)
    ff = _gelu_exact(ff)
    acc_sc[...] += jnp.dot(ff.astype(jnp.bfloat16), w2_ref[...],
                           preferred_element_type=jnp.float32)       # (tm, H)

    @pl.when(fi == pl.num_programs(1) - 1)
    def _():
        o_ref[...] = (x1_ref[...] + acc_sc[...] + b2_ref[...]).astype(o_ref.dtype)


def _ln_mlp(x1, g2, be2, w1_bf16, b1, w2_bf16, b2, *, eps, tm, tf, out_dtype):
    M, H = x1.shape
    F = w1_bf16.shape[1]
    cost = pl.CostEstimate(
        flops=int(4 * M * H * F),
        transcendentals=int(M * F + M),
        bytes_accessed=int(M * H * 4 + (M // tm) * 2 * H * F * 2 + M * H * 4))
    return pl.pallas_call(
        functools.partial(_ln_mlp_kernel, eps=eps),
        out_shape=jax.ShapeDtypeStruct((M, H), out_dtype),
        grid_spec=pltpu.PrefetchScalarGridSpec(
            num_scalar_prefetch=0,
            grid=(M // tm, F // tf),
            in_specs=[
                pl.BlockSpec((tm, H), lambda mi, fi: (mi, 0)),   # x1 (residual/LN2)
                pl.BlockSpec((1, H), lambda mi, fi: (0, 0)),     # ln2 gamma
                pl.BlockSpec((1, H), lambda mi, fi: (0, 0)),     # ln2 beta
                pl.BlockSpec((H, tf), lambda mi, fi: (0, fi)),   # W1 chunk
                pl.BlockSpec((1, tf), lambda mi, fi: (0, fi)),   # b1 chunk
                pl.BlockSpec((tf, H), lambda mi, fi: (fi, 0)),   # W2 chunk
                pl.BlockSpec((1, H), lambda mi, fi: (0, 0)),     # b2
            ],
            out_specs=pl.BlockSpec((tm, H), lambda mi, fi: (mi, 0)),
            scratch_shapes=[
                pltpu.VMEM((tm, H), jnp.bfloat16),   # LN2 output (fc1 input)
                pltpu.VMEM((tm, H), jnp.float32),    # fc2 accumulator
            ]),
        compiler_params=pltpu.CompilerParams(
            dimension_semantics=("parallel", "arbitrary"),
            vmem_limit_bytes=_VMEM_LIMIT),
        cost_estimate=cost,
    )(x1, g2, be2, w1_bf16, b1, w2_bf16, b2)


# ----------------------------------------------------------------------------
# Top-level wrapper
# ----------------------------------------------------------------------------
def transformer_layer(x, params, *, n_head, eps=1e-5,
                      row_tile=512, q_tile=512, kv_tile=1024,
                      qkv_col_tile=1024, proj_col_tile=512, ff_tile=1024):
    B, S, H = x.shape
    assert H % n_head == 0
    D = H // n_head
    M = B * S
    scale = 1.0 / math.sqrt(D)

    tm = min(row_tile, M)
    tq = min(q_tile, S)
    tk = min(kv_tile, S)
    tc = min(qkv_col_tile, 3 * H)
    tp = min(proj_col_tile, H)
    tf = min(ff_tile, 4 * H)
    assert M % tm == 0 and S % tq == 0 and S % tk == 0
    assert (3 * H) % tc == 0 and H % tp == 0 and (4 * H) % tf == 0

    bf16 = jnp.bfloat16
    # Fold the 1/sqrt(head_dim) softmax scale into the q columns of Wqkv / bqkv
    # (free one-time transform; removes a (tq,tk) VALU multiply per KV step).
    col_scale = jnp.concatenate(
        [jnp.full((H,), scale, jnp.float32), jnp.ones((2 * H,), jnp.float32)])
    wqkv = (params['wqkv'] * col_scale[None, :]).astype(bf16)
    bqkv = params['bqkv'] * col_scale[None, :]
    wproj = params['wproj'].astype(bf16)
    w1 = params['w1'].astype(bf16)
    w2 = params['w2'].astype(bf16)
    # TODO(synk): fp8 (e4m3) weight storage + per-channel scales for v7x.

    x2d = x.reshape(M, H)

    # --- K1: LN1 + QKV projection ((B,S) flattened, Wqkv columns streamed) ---
    qkv = _ln_qkv(x2d, params['ln1_g'], params['ln1_b'], wqkv, bqkv,
                  eps=eps, tm=tm, tc=tc)                        # (M, 3H) bf16

    # --- K2: flash attention over KV tiles (online softmax) ---
    if D % 128 == 0:
        # Heads indexed straight out of (B,S,3H); output written straight into
        # (B,S,H) -> no wrapper-side split/merge transposes (4 HBM round trips
        # removed).
        attn2d = _flash_attention_fused(
            qkv.reshape(B, S, 3 * H), n_head=n_head, head_dim=D,
            tq=tq, tk=tk).reshape(M, H)
    else:
        # Fallback for lane-misaligned head_dim (toy configs only): explicit
        # head split/merge in the wrapper.
        qkv4 = qkv.reshape(B, S, 3, n_head, D).transpose(2, 0, 3, 1, 4)
        attn = _flash_attention_split(qkv4[0], qkv4[1], qkv4[2], tq=tq, tk=tk)
        attn2d = attn.transpose(0, 2, 1, 3).reshape(M, H)

    # --- K3a: attention output projection + residual (Wproj columns streamed) ---
    x1 = _proj_residual(x2d, attn2d, wproj, params['bproj'], tm=tm, tc=tp)

    # --- K3b: LN2 + MLP (fc1 + exact gelu + fc2), 4H-chunked reduction ---
    out2d = _ln_mlp(x1, params['ln2_g'], params['ln2_b'], w1, params['b1'],
                    w2, params['b2'], eps=eps, tm=tm, tf=tf, out_dtype=x.dtype)
    return out2d.reshape(B, S, H)


# ----------------------------------------------------------------------------
# Pure-JAX f32 reference (mirrors the PyTorch variant1 forward, eval mode)
# ----------------------------------------------------------------------------
def transformer_layer_reference(x, params, *, n_head, eps=1e-5):
    B, S, H = x.shape
    D = H // n_head

    def ln(x, g, b):
        mu = jnp.mean(x, axis=-1, keepdims=True)
        var = jnp.mean((x - mu) ** 2, axis=-1, keepdims=True)
        return (x - mu) * jax.lax.rsqrt(var + eps) * g + b

    h = ln(x, params['ln1_g'][0], params['ln1_b'][0])
    qkv = h @ params['wqkv'] + params['bqkv'][0]
    qkv = qkv.reshape(B, S, 3, n_head, D).transpose(2, 0, 3, 1, 4)
    q, k, v = qkv[0], qkv[1], qkv[2]
    scores = jnp.einsum('bhqd,bhkd->bhqk', q, k) / math.sqrt(D)
    p = jax.nn.softmax(scores, axis=-1)
    a = jnp.einsum('bhqk,bhkd->bhqd', p, v)
    a = a.transpose(0, 2, 1, 3).reshape(B, S, H)
    x1 = x + (a @ params['wproj'] + params['bproj'][0])
    h2 = ln(x1, params['ln2_g'][0], params['ln2_b'][0])
    ff = jax.nn.gelu(h2 @ params['w1'] + params['b1'][0], approximate=False)
    ff = ff @ params['w2'] + params['b2'][0]
    return x1 + ff


def init_params(key, hidden_size):
    H = hidden_size
    ks = jax.random.split(key, 4)
    std = 0.02
    return {
        'ln1_g': jnp.ones((1, H), jnp.float32),
        'ln1_b': jnp.zeros((1, H), jnp.float32),
        'ln2_g': jnp.ones((1, H), jnp.float32),
        'ln2_b': jnp.zeros((1, H), jnp.float32),
        'wqkv': jax.random.normal(ks[0], (H, 3 * H), jnp.float32) * std,
        'bqkv': jnp.zeros((1, 3 * H), jnp.float32),
        'wproj': jax.random.normal(ks[1], (H, H), jnp.float32) * std,
        'bproj': jnp.zeros((1, H), jnp.float32),
        'w1': jax.random.normal(ks[2], (H, 4 * H), jnp.float32) * std,
        'b1': jnp.zeros((1, 4 * H), jnp.float32),
        'w2': jax.random.normal(ks[3], (4 * H, H), jnp.float32) * std,
        'b2': jnp.zeros((1, H), jnp.float32),
    }


if __name__ == "__main__":
    key = jax.random.PRNGKey(0)
    k1, k2, k3, k4, k5, k6 = jax.random.split(key, 6)

    # ---- test 1: toy config consistent with the module (single-tile path,
    #      D=8 -> lane-misaligned fallback head path) ----
    B, S, H, NH = 2, 8, 32, 4
    x = jax.random.normal(k1, (B, S, H), jnp.float32)
    params = init_params(k2, H)
    out = jax.block_until_ready(transformer_layer(x, params, n_head=NH, eps=1e-5))
    ref = transformer_layer_reference(x, params, n_head=NH, eps=1e-5)
    assert out.shape == (B, S, H)
    err = float(jnp.max(jnp.abs(out.astype(jnp.float32) - ref)))
    assert err < 2e-2, f"toy config max abs err = {err}"

    # ---- test 2: lane-aligned heads (D=128) + multi-tile grids ->
    #      exercises BlockSpec head-indexing flash path (no wrapper transposes),
    #      QKV/Wproj column streaming, 4H-chunked MLP reduction ----
    B2, S2, H2, NH2 = 2, 256, 256, 2
    x2 = jax.random.normal(k3, (B2, S2, H2), jnp.float32)
    params2 = init_params(k4, H2)
    out2 = jax.block_until_ready(
        transformer_layer(x2, params2, n_head=NH2, eps=1e-5,
                          row_tile=128, q_tile=128, kv_tile=128,
                          qkv_col_tile=256, proj_col_tile=128, ff_tile=256))
    ref2 = transformer_layer_reference(x2, params2, n_head=NH2, eps=1e-5)
    err2 = float(jnp.max(jnp.abs(out2.astype(jnp.float32) - ref2)))
    assert err2 < 5e-2, f"lane-aligned config max abs err = {err2}"

    # ---- test 3: multi-tile fallback head path (D=32) ----
    B3, S3, H3, NH3 = 2, 128, 128, 4
    x3 = jax.random.normal(k5, (B3, S3, H3), jnp.float32)
    params3 = init_params(k6, H3)
    out3 = jax.block_until_ready(
        transformer_layer(x3, params3, n_head=NH3, eps=1e-5,
                          row_tile=128, q_tile=64, kv_tile=64,
                          qkv_col_tile=128, proj_col_tile=128, ff_tile=128))
    ref3 = transformer_layer_reference(x3, params3, n_head=NH3, eps=1e-5)
    err3 = float(jnp.max(jnp.abs(out3.astype(jnp.float32) - ref3)))
    assert err3 < 5e-2, f"fallback multi-tile max abs err = {err3}"

    # TODO(synk): kv-cache concatenation / attention_mask / dropout paths are
    # runtime-optional in the PyTorch forward and are not exercised here
    # (eval mode, mask=None, past_key_values=None).
    print("KERNEL_OK")
</pallas_src>

<mosaic_0001>
module attributes {stable_mosaic.version = 11 : i64} {
  func.func @_ln_qkv_kernel(%arg0: i32, %arg1: i32, %arg2: memref<16x32xf32, #tpu.memory_space<vmem>>, %arg3: memref<1x32xf32, #tpu.memory_space<vmem>>, %arg4: memref<1x32xf32, #tpu.memory_space<vmem>>, %arg5: memref<32x96xbf16, #tpu.memory_space<vmem>>, %arg6: memref<1x96xf32, #tpu.memory_space<vmem>>, %arg7: memref<16x96xbf16, #tpu.memory_space<vmem>>, %arg8: memref<16x32xbf16, #tpu.memory_space<vmem>>) attributes {dimension_semantics = [#tpu.dimension_semantics<parallel>, #tpu.dimension_semantics<arbitrary>], iteration_bounds = array<i64: 1, 1>, scalar_prefetch = 0 : i64, scratch_operands = 1 : i64, tpu.core_type = #tpu.core_type<tc>, window_params = [{transform_indices = @transform_0, window_bounds = array<i64: 16, 32>}, {pipeline_mode = #tpu.pipeline_mode<synchronous>, transform_indices = @transform_1, window_bounds = array<i64: 1, 32>}, {pipeline_mode = #tpu.pipeline_mode<synchronous>, transform_indices = @transform_2, window_bounds = array<i64: 1, 32>}, {transform_indices = @transform_3, window_bounds = array<i64: 32, 96>}, {transform_indices = @transform_4, window_bounds = array<i64: 1, 96>}, {transform_indices = @transform_5, window_bounds = array<i64: 16, 96>}]} {
    %c0_i32 = arith.constant 0 : i32
    %0 = arith.cmpi eq, %arg1, %c0_i32 : i32
    %1 = arith.extui %0 : i1 to i32
    %c0_i32_0 = arith.constant 0 : i32
    %2 = arith.cmpi ne, %1, %c0_i32_0 : i32
    scf.if %2 {
      %c0_8 = arith.constant 0 : index
      %c0_9 = arith.constant 0 : index
      %11 = vector.load %arg2[%c0_8, %c0_9] : memref<16x32xf32, #tpu.memory_space<vmem>>, vector<16x32xf32>
      %c0_10 = arith.constant 0 : index
      %c0_11 = arith.constant 0 : index
      %12 = vector.load %arg3[%c0_10, %c0_11] : memref<1x32xf32, #tpu.memory_space<vmem>>, vector<1x32xf32>
      %c0_12 = arith.constant 0 : index
      %c0_13 = arith.constant 0 : index
      %13 = vector.load %arg4[%c0_12, %c0_13] : memref<1x32xf32, #tpu.memory_space<vmem>>, vector<1x32xf32>
      %cst_14 = arith.constant dense<0.000000e+00> : vector<16xf32>
      %14 = vector.multi_reduction <add>, %11, %cst_14 [1] : vector<16x32xf32> to vector<16xf32>
      %15 = vector.shape_cast %14 : vector<16xf32> to vector<16x1xf32>
      %16 = arith.mulf %11, %11 : vector<16x32xf32>
      %cst_15 = arith.constant dense<0.000000e+00> : vector<16xf32>
      %17 = vector.multi_reduction <add>, %16, %cst_15 [1] : vector<16x32xf32> to vector<16xf32>
      %18 = vector.shape_cast %17 : vector<16xf32> to vector<16x1xf32>
      %cst_16 = arith.constant 3.125000e-02 : f32
      %19 = vector.broadcast %cst_16 : f32 to vector<16x1xf32>
      %20 = arith.mulf %15, %19 : vector<16x1xf32>
      %cst_17 = arith.constant 3.125000e-02 : f32
      %21 = vector.broadcast %cst_17 : f32 to vector<16x1xf32>
      %22 = arith.mulf %18, %21 : vector<16x1xf32>
      %23 = arith.mulf %20, %20 : vector<16x1xf32>
      %24 = arith.subf %22, %23 : vector<16x1xf32>
      %cst_18 = arith.constant 0.000000e+00 : f32
      %25 = vector.broadcast %cst_18 : f32 to vector<16x1xf32>
      %26 = arith.maximumf %24, %25 : vector<16x1xf32>
      %27 = vector.broadcast %20 : vector<16x1xf32> to vector<16x32xf32>
      %28 = arith.subf %11, %27 : vector<16x32xf32>
      %cst_19 = arith.constant 9.99999974E-6 : f32
      %29 = vector.broadcast %cst_19 : f32 to vector<16x1xf32>
      %30 = arith.addf %26, %29 : vector<16x1xf32>
      %31 = math.rsqrt %30 : vector<16x1xf32>
      %32 = vector.broadcast %31 : vector<16x1xf32> to vector<16x32xf32>
      %33 = arith.mulf %28, %32 : vector<16x32xf32>
      %34 = vector.broadcast %12 : vector<1x32xf32> to vector<16x32xf32>
      %35 = arith.mulf %33, %34 : vector<16x32xf32>
      %36 = vector.broadcast %13 : vector<1x32xf32> to vector<16x32xf32>
      %37 = arith.addf %35, %36 : vector<16x32xf32>
      %38 = arith.truncf %37 : vector<16x32xf32> to vector<16x32xbf16>
      %c0_20 = arith.constant 0 : index
      %c0_21 = arith.constant 0 : index
      %39 = vector.load %arg8[%c0_20, %c0_21] : memref<16x32xbf16, #tpu.memory_space<vmem>>, vector<16x32xbf16>
      tpu.vector_store %arg8[%c0_20, %c0_21], %38 {strides = array<i32>} : memref<16x32xbf16, #tpu.memory_space<vmem>>, vector<16x32xbf16>,
    } else {
    }
    %c0 = arith.constant 0 : index
    %c0_1 = arith.constant 0 : index
    %3 = vector.load %arg8[%c0, %c0_1] : memref<16x32xbf16, #tpu.memory_space<vmem>>, vector<16x32xbf16>
    %c0_2 = arith.constant 0 : index
    %c0_3 = arith.constant 0 : index
    %4 = vector.load %arg5[%c0_2, %c0_3] : memref<32x96xbf16, #tpu.memory_space<vmem>>, vector<32x96xbf16>
    %cst = arith.constant dense<0.000000e+00> : vector<16x96xf32>
    %5 = tpu.matmul %3, %4, %cst {dimension_numbers = #tpu.dot_dimension_numbers<[1], [0], [0], [1], [0, 0, 1, 1], [], []>} : vector<16x32xbf16>, vector<32x96xbf16>, vector<16x96xf32> -> vector<16x96xf32>
    %c0_4 = arith.constant 0 : index
    %c0_5 = arith.constant 0 : index
    %6 = vector.load %arg6[%c0_4, %c0_5] : memref<1x96xf32, #tpu.memory_space<vmem>>, vector<1x96xf32>
    %7 = vector.broadcast %6 : vector<1x96xf32> to vector<16x96xf32>
    %8 = arith.addf %5, %7 : vector<16x96xf32>
    %9 = arith.truncf %8 : vector<16x96xf32> to vector<16x96xbf16>
    %c0_6 = arith.constant 0 : index
    %c0_7 = arith.constant 0 : index
    %10 = vector.load %arg7[%c0_6, %c0_7] : memref<16x96xbf16, #tpu.memory_space<vmem>>, vector<16x96xbf16>
    tpu.vector_store %arg7[%c0_6, %c0_7], %9 {strides = array<i32>} : memref<16x96xbf16, #tpu.memory_space<vmem>>, vector<16x96xbf16>,
    return
  }
  func.func @transform_0(%arg0: i32, %arg1: i32) -> (i32, i32) {
    %c0_i32 = arith.constant 0 : i32
    %c0_i32_0 = arith.constant 0 : i32
    return %arg0, %c0_i32 : i32, i32
  }
  func.func @transform_1(%arg0: i32, %arg1: i32) -> (i32, i32) {
    %c0_i32 = arith.constant 0 : i32
    %c0_i32_0 = arith.constant 0 : i32
    %c0_i32_1 = arith.constant 0 : i32
    return %c0_i32, %c0_i32_0 : i32, i32
  }
  func.func @transform_2(%arg0: i32, %arg1: i32) -> (i32, i32) {
    %c0_i32 = arith.constant 0 : i32
    %c0_i32_0 = arith.constant 0 : i32
    %c0_i32_1 = arith.constant 0 : i32
    return %c0_i32, %c0_i32_0 : i32, i32
  }
  func.func @transform_3(%arg0: i32, %arg1: i32) -> (i32, i32) {
    %c0_i32 = arith.constant 0 : i32
    %c0_i32_0 = arith.constant 0 : i32
    return %c0_i32, %arg1 : i32, i32
  }
  func.func @transform_4(%arg0: i32, %arg1: i32) -> (i32, i32) {
    %c0_i32 = arith.constant 0 : i32
    %c0_i32_0 = arith.constant 0 : i32
    return %c0_i32, %arg1 : i32, i32
  }
  func.func @transform_5(%arg0: i32, %arg1: i32) -> (i32, i32) {
    %c0_i32 = arith.constant 0 : i32
    return %arg0, %arg1 : i32, i32
  }
}

</mosaic_0001>

<bundles_post_ra>
// kernel: tpu_custom_call.1
= control target key start
LH: loop header
LB: loop body
LE: loop exit
PB: predicated region body
PF: predicated region fallthrough
CT: control target
= control target key end

     0   :  { %10 = vsyncpa [#allocation4], 0  ;;  %s398_s0 = inlined_call_operand.hbm [shape: f32[16,32], index: 0, kind: input, shape index: {}]   ;;  %s399_s1 = inlined_call_operand.vmem [shape: f32[1,32], index: 1, kind: input, shape index: {}]   ;;  %s400_s2 = inlined_call_operand.vmem [shape: f32[1,32], index: 2, kind: input, shape index: {}]   ;;  %s401_s3 = inlined_call_operand.hbm [shape: bf16[32,96], index: 3, kind: input, shape index: {}]   ;;  %s402_s4 = inlined_call_operand.vmem [shape: f32[1,96], index: 4, kind: input, shape index: {}]   ;;  %s403_s5 = inlined_call_operand.hbm [shape: bf16[16,96], index: 5, kind: output, shape index: {}]  }
   0x1   :  { %11 = vsyncpa [#allocation7], 0 }
   0x2   :  { %12 = vsyncpa [#allocation5], 0  ;;  %s330_s18 = smov [#allocation3]  }
   0x3   :  { %s18_s19 = sshll.u32 %s330_s18, 4  ;;  %s19_s19 = int_to_ptr.vmem [resolvable:$true] %s18_s19 }
   0x4   :  { %s272_s20 = scalar_lea.vmem %s19_s19, 256  ;;  %p277_p1 = scmp.lt.s32.totalorder %s19_s19, %s19_s19 }
   0x5   :  { %p273_p0 = scmp.ne.s32.totalorder %s19_s19, %s272_s20  ;;  %p278_p2 = scmp.lt.s32.totalorder %s272_s20, %s272_s20 }
   0x7   :  { %p279_p3 = por %p278_p2, %p277_p1 }
   0x9   :  { %p280_p4 = pnand %p279_p3, %p273_p0 }
   0xb   :  { %283 = shalt.err (!%p280_p4)
}
   0xc   :  { %s331_s21 = smov 128   ;;  %s332_s22 = smov 8  }
   0xd   :  { %24 = dma.hbm_to_vmem [thread:$0]  %s398_s0, 256, %s19_s19, [#allocation4], %s331_s21, %s331_s21, %s332_s22  }
   0xe   :  { %s333_s25 = smov [#allocation6]  }
   0xf   :  { %s34_s26 = sshll.u32 %s333_s25, 4  ;;  %s35_s26 = int_to_ptr.vmem [resolvable:$true] %s34_s26 }
  0x10   :  { %s292_s27 = scalar_lea.vmem %s35_s26, 256  ;;  %p297_p6 = scmp.lt.s32.totalorder %s35_s26, %s35_s26 }
  0x11   :  { %p293_p5 = scmp.ne.s32.totalorder %s35_s26, %s292_s27  ;;  %p298_p7 = scmp.lt.s32.totalorder %s292_s27, %s292_s27 }
  0x13   :  { %p299_p8 = por %p298_p7, %p297_p6 }
  0x15   :  { %p300_p9 = pnand %p299_p8, %p293_p5 }
  0x17   :  { %303 = shalt.err (!%p300_p9)
}
  0x18   :  { %s334_s28 = smov 64   ;;  %s335_s29 = smov 4  }
  0x19   :  { %40 = dma.hbm_to_vmem [thread:$0]  %s401_s3, 256, %s35_s26, [#allocation7], %s334_s28, %s334_s28, %s335_s29  }
  0x1a   :  { %324 = dma.done.wait [#allocation4], 256  }
  0x1b   :  { %325 = vsyncadd [#allocation4], 4294967040 }
  0x1c   :  { %326 = dma.done.wait [#allocation7], 256  }
  0x1d   :  { %327 = vsyncadd [#allocation7], 4294967040  ;;  %vm58_vm0 = vcmask 261120   ;;  %v54_v0 = vld [vmem:[#allocation3] sm:$0xff]  ;;  %v55_v1 = vld [vmem:[#allocation3 + $0x8] sm:$0xff]  ;;  %v336_v9 = vmov 0.0  }
  0x1e   :  { %v59_v2 = vsel %vm58_vm0, %v54_v0, 0.0  ;;  %v65_v3 = vmul.f32 %v54_v0, %v54_v0  ;;  %v66_v4 = vmul.f32 %v55_v1, %v55_v1  ;;  %v62_v6 = vsel %vm58_vm0, %v55_v1, 0.0  ;;  %v257_v8 = vld [vmem:[#allocation6 + $0x8] sm:$0xff]   ;;  %240 = vmatprep.subr.bf16.mxu0 %v336_v9  ;;  %v258_v10 = vld [vmem:[#allocation6] sm:$0xff]  }
  0x1f   :  { %60 = vadd.xlane.f32.xlu0 %v59_v2  ;;  %vm337_vm1 = vmmov 0   ;;  %241 = vmatpush3.bf16.msra.mxu0 %v257_v8  ;;  %v222_v29 = vld [vmem:[%s399_s1] ss:$0 sm:$0xff]  ;;  %vm115_vm2 = vcmask 257024   ;;  %vm201_vm3 = vcmask 781312  }
  0x20   :  { %v67_v5 = vsel %vm58_vm0, %v65_v3, 0.0  ;;  %v70_v7 = vsel %vm58_vm0, %v66_v4, 0.0  ;;  %244 = vmatprep.mubr.msk.bf16.mxu0 %vm337_vm1, %v336_v9  ;;  %242 = vmatprep.subr.bf16.mxu0 %v336_v9  ;;  %v223_v31 = vld [vmem:[%s400_s2] ss:$0 sm:$0xff]  ;;  %s338_s2 = smov [#allocation8]  }
  0x21   :  { %68 = vadd.xlane.f32.xlu1 %v67_v5  ;;  %v226_v42 = vld [vmem:[%s402_s4] ss:$0 sm:$0xff]  ;;  %s209_s10 = sshll.u32 %s338_s2, 4  ;;  %s210_s10 = int_to_ptr.vmem [resolvable:$true] %s209_s10 }
  0x22   :  { %s304_s11 = scalar_lea.vmem %s210_s10, 128  ;;  %p309_p11 = scmp.lt.s32.totalorder %s210_s10, %s210_s10 }
  0x23   :  { %63 = vadd.xlane.f32.xlu0 %v62_v6  ;;  %243 = vmatpush3.bf16.msra.mxu0 %v258_v10  ;;  %p305_p10 = scmp.ne.s32.totalorder %s210_s10, %s304_s11  ;;  %p310_p12 = scmp.lt.s32.totalorder %s304_s11, %s304_s11 }
  0x25   :  { %71 = vadd.xlane.f32.xlu1 %v70_v7  ;;  %p311_p13 = por %p310_p12, %p309_p11 }
  0x27   :  { %p312_p0 = pnand %p311_p13, %p305_p10 }
  0xa8   :  { %v61_v11 = vpop.xlane.xlu0 %60 }
  0xa9   :  { %v73_v12 = vmul.f32 0.03125, %v61_v11 }
  0xaa   :  { %v69_v13 = vpop.xlane.xlu1 %68 }
  0xab   :  { %v77_v14 = vmul.f32 %v73_v12, %v73_v12  ;;  %v75_v15 = vmul.f32 0.03125, %v69_v13  ;;  %v83_v27 = vsub.f32 %v54_v0, %v73_v12 }
  0xac   :  { %v64_v16 = vpop.xlane.xlu0 %63 }
  0xad   :  { %v79_v17 = vsub.f32 %v75_v15, %v77_v14  ;;  %v74_v18 = vmul.f32 0.03125, %v64_v16 }
  0xae   :  { %v72_v19 = vpop.xlane.xlu1 %71 }
  0xaf   :  { %v81_v20 = vmax.f32 %v79_v17, 0.0  ;;  %v78_v21 = vmul.f32 %v74_v18, %v74_v18  ;;  %v76_v22 = vmul.f32 0.03125, %v72_v19  ;;  %v84_v33 = vsub.f32 %v55_v1, %v74_v18 }
  0xb1   :  { %v85_v23 = vadd.f32 1e-05, %v81_v20  ;;  %v80_v24 = vsub.f32 %v76_v22, %v78_v21 }
  0xb3   :  { %260 = vrsqrt.f32 %v85_v23  ;;  %v82_v25 = vmax.f32 %v80_v24, 0.0 }
  0xb5   :  { %v86_v26 = vadd.f32 1e-05, %v82_v25 }
  0xb7   :  { %262 = vrsqrt.f32 %v86_v26 }
  0xc0   :  { %v261_v28 = vpop.eup %260 }
  0xc1   :  { %v89_v30 = vmul.f32 %v261_v28, %v83_v27 }
  0xc3   :  { %v97_v32 = vmul.f32 %v222_v29, %v89_v30 }
  0xc4   :  { %v263_v34 = vpop.eup %262 }
  0xc5   :  { %v105_v35 = vadd.f32 %v223_v31, %v97_v32  ;;  %v90_v36 = vmul.f32 %v263_v34, %v84_v33 }
  0xc7   :  { %v233_v37 = vpack.c.bf16 %v105_v35, %v105_v35  ;;  %v98_v38 = vmul.f32 %v222_v29, %v90_v36 }
  0xc9   :  { %116 = vst.msk [vmem:[#allocation2] sm:$0xf] %vm115_vm2, %v233_v37  ;;  %v106_v39 = vadd.f32 %v223_v31, %v98_v38 }
  0xcb   :  { %v234_v40 = vpack.c.bf16 %v106_v39, %v106_v39 }
  0xcd   :  { %117 = vst.msk [vmem:[#allocation2 + $0x4] sm:$0xf] %vm115_vm2, %v234_v40 }
  0xd4   :  { %v259_v41 = vld [vmem:[#allocation2] sm:$0xff]  }
  0xd5   :  { %245 = vmatmul.mubr.msk.bf16.vlgmr.msra.gmra.mxu0 %vm58_vm0, %v259_v41 }
 0x195   :  { %v186_v43 = vpop.f32.mrf.mxu0 }
 0x196   :  { %v187_v44 = vadd.f32 %v226_v42, %v186_v43 }
 0x197   :  { %v246_v45 = vpop.f32.mrf.mxu0 }
 0x198   :  { %v235_v46 = vpack.c.bf16 %v187_v44, %v187_v44 }
 0x199   :  { %v189_v47 = vpop.f32.mrf.mxu0 }
 0x19a   :  { %v190_v48 = vadd.f32 %v226_v42, %v189_v47  ;;  %202 = vst.msk [vmem:[#allocation8] sm:$0xf] %vm201_vm3, %v235_v46 }
 0x19b   :  { %v247_v49 = vpop.f32.mrf.mxu0 }
 0x19c   :  { %v236_v50 = vpack.c.bf16 %v190_v48, %v190_v48 }
 0x19e   :  { %203 = vst.msk [vmem:[#allocation8 + $0x4] sm:$0xf] %vm201_vm3, %v236_v50 }
 0x19f   :  { %315 = shalt.err (!%p312_p0)
}
 0x1a0   :  { %215 = dma.vmem_to_hbm [thread:$0]  %s210_s10, 128, %s403_s5, [#allocation5], %s334_s28, %s334_s28, %s335_s29  }
 0x1a1   :  { %328 = dma.done.wait [#allocation5], 128  }
 0x1a2   :  { %329 = vsyncadd [#allocation5], 4294967168 }
 0x1a3   :  { %219 = vsyncpa [#allocation4], 1 }
 0x1a4   :  { %220 = vsyncpa [#allocation7], 1 }
 0x1a5   :  { %221 = vsyncpa [#allocation5], 1 }

</bundles_post_ra>
